<compile_context>
chip_gen: v7x
topology: tpu7x:2x2x1
jax: 0.10.0
libtpu: 0.0.40
codegen_flags: <defaults>
</compile_context>

<pallas_src>
import functools

import jax
import jax.numpy as jnp
from jax.experimental import pallas as pl
from jax.experimental.pallas import tpu as pltpu


# ---------------------------------------------------------------------------
# Kernels
# ---------------------------------------------------------------------------
def _gather_excite_fused_kernel(x_ref, w1_ref, b1_ref, w2_ref, b2_ref, o_ref,
                                *, add_maxpool):
    """Single-pass: x tile holds whole batch elements; gather+excite+scale fused."""
    x = x_ref[...]                                         # (nb, C, HW), native dtype

    # --- gather: global average pool over the flattened spatial (lane) axis.
    s = jnp.mean(x.astype(jnp.float32), axis=-1)           # (nb, C) f32
    if add_maxpool:
        s = 0.5 * s + 0.5 * jnp.max(x, axis=-1).astype(jnp.float32)

    # --- excite: the 1x1-conv MLP == two tiny dense layers over channels (f32).
    h = jnp.dot(s, w1_ref[...], preferred_element_type=jnp.float32) + b1_ref[...]
    h = jnp.maximum(h, 0.0)                                 # ReLU
    y = jnp.dot(h, w2_ref[...], preferred_element_type=jnp.float32) + b2_ref[...]
    gate = jax.nn.sigmoid(y)                                # (nb, C) f32

    # --- scale: cast only the tiny gate, multiply in the input's native dtype
    # (avoids a full-tile f32 temporary for bf16 inputs), lane-dense store.
    o_ref[...] = (x * gate.astype(x.dtype)[:, :, None]).astype(o_ref.dtype)


def _gather_gate_kernel(x_ref, w1_ref, b1_ref, w2_ref, b2_ref, gate_ref,
                        sum_sc, max_sc, *, hw_total, add_maxpool):
    """Two-pass fallback, pass 1: accumulate the spatial reduction over HW
    chunks, then run the MLP + sigmoid on the last chunk to emit the gate."""
    j = pl.program_id(1)

    @pl.when(j == 0)
    def _():
        sum_sc[...] = jnp.zeros_like(sum_sc)
        max_sc[...] = jnp.full_like(max_sc, -jnp.inf)

    x = x_ref[...]                                          # (1, C, chunk)
    sum_sc[...] += jnp.sum(x.astype(jnp.float32), axis=-1)  # (1, C)
    if add_maxpool:
        max_sc[...] = jnp.maximum(max_sc[...], jnp.max(x, axis=-1).astype(jnp.float32))

    @pl.when(j == pl.num_programs(1) - 1)
    def _():
        s = sum_sc[...] * (1.0 / float(hw_total))
        if add_maxpool:
            s = 0.5 * s + 0.5 * max_sc[...]
        h = jnp.dot(s, w1_ref[...], preferred_element_type=jnp.float32) + b1_ref[...]
        h = jnp.maximum(h, 0.0)
        y = jnp.dot(h, w2_ref[...], preferred_element_type=jnp.float32) + b2_ref[...]
        gate_ref[...] = jax.nn.sigmoid(y)[:, None, :].astype(gate_ref.dtype)


def _scale_kernel(x_ref, gate_ref, o_ref):
    """Two-pass fallback, pass 2: out = x * gate (broadcast over HW chunk)."""
    g = gate_ref[0].astype(x_ref.dtype)                     # (1, C)
    o_ref[...] = (x_ref[...] * g[:, :, None]).astype(o_ref.dtype)


# ---------------------------------------------------------------------------
# Tiling / budgeting helpers
# ---------------------------------------------------------------------------
def _vmem_capacity_bytes():
    try:
        return int(pltpu.get_tpu_info().vmem_capacity_bytes)
    except Exception:
        return 64 << 20  # v7x has the smallest VMEM of current gens; safe floor.


def _vmem_limit(cap_bytes, resident_bytes):
    # Lift the 16/32 MiB scoped default when the chosen tiles need it, but
    # leave headroom under the physical capacity.
    return int(min(cap_bytes * 7 // 8, max(32 << 20, resident_bytes + (2 << 20))))


def _choose_batch_block(n, per_elem_bytes, tile_budget_bytes, block_bytes_target):
    """Largest batch block nb (divisor of n) whose double-buffered in+out
    residency (~4 tiles) fits the budget.  Only split into >=2 grid steps if
    the per-step tile stays >= ~512 KiB; otherwise keep the bigger tile."""
    max_nb = tile_budget_bytes // max(4 * per_elem_bytes, 1)
    if max_nb < 1:
        return None                              # one element alone doesn't fit
    divisors = [d for d in range(1, n + 1) if n % d == 0 and d <= max_nb]
    nb = max(divisors)                           # default: biggest tile, fewest steps
    min_tile = 512 << 10
    cand = [d for d in divisors if n // d >= 2 and d * per_elem_bytes >= min_tile]
    if cand:
        # Prefer more steps (pipeline depth / 2nd TC on v7x) while keeping the
        # tile at or above the ~1 MiB soft target; else the largest >=512 KiB.
        pref = [d for d in cand if d * per_elem_bytes >= block_bytes_target]
        nb = min(pref) if pref else max(cand)
    return nb


def _choose_hw_chunk(hw, c, itemsize, tile_budget_bytes):
    """Largest lane-dense (multiple-of-128) divisor of HW whose tile fits."""
    max_chunk = tile_budget_bytes // max(4 * c * itemsize, 1)
    best = None
    for d in range(128, hw + 1, 128):
        if hw % d == 0 and d <= max_chunk:
            best = d
    if best is None and hw <= max_chunk:
        best = hw
    return best


# ---------------------------------------------------------------------------
# Wrapper
# ---------------------------------------------------------------------------
def gather_excite_forward(x, w1, b1, w2, b2, *, add_maxpool=False,
                          block_bytes_target=1 << 20, force_two_pass=False):
    """GatherExcite forward (extent=0, use_mlp=True, sigmoid gate).

    x:  (N, C, H, W)
    w1: (C, R) fc1 weight (R = reduced channels), b1: (R,)
    w2: (R, C) fc2 weight,                        b2: (C,)
    """
    n, c, h, w = x.shape
    hw = h * w
    r = w1.shape[1]
    assert w1.shape == (c, r) and w2.shape == (r, c)
    assert b1.shape == (r,) and b2.shape == (c,)

    x_flat = x.reshape(n, c, hw)
    b1_2d = b1.reshape(1, r)
    b2_2d = b2.reshape(1, c)

    itemsize = x.dtype.itemsize
    per_elem_bytes = c * hw * itemsize
    param_bytes = (c * r * 2 + c + r) * 4

    cap = _vmem_capacity_bytes()
    tile_budget = min(24 << 20, cap // 3)        # cap on 2*(in)+2*(out) residency

    nb = None if force_two_pass else _choose_batch_block(
        n, per_elem_bytes, tile_budget, block_bytes_target)

    # ------------------------------------------------------------------ fused
    if nb is not None:
        grid = (n // nb,)
        kernel = functools.partial(_gather_excite_fused_kernel,
                                   add_maxpool=add_maxpool)
        resident = 4 * nb * per_elem_bytes + param_bytes
        cost = pl.CostEstimate(
            flops=int(3 * n * c * hw + 4 * n * c * r),
            transcendentals=int(n * c),
            bytes_accessed=int(2 * n * c * hw * itemsize + param_bytes),
        )
        # TODO(synk): when N=1 on v7x only one TensorCore gets work on this
        # path; batch inputs before calling, or rely on the two-pass path.
        out_flat = pl.pallas_call(
            kernel,
            out_shape=jax.ShapeDtypeStruct((n, c, hw), x.dtype),
            grid_spec=pltpu.PrefetchScalarGridSpec(
                num_scalar_prefetch=0,
                grid=grid,
                in_specs=[
                    pl.BlockSpec((nb, c, hw), lambda i: (i, 0, 0)),  # x tile
                    pl.BlockSpec((c, r), lambda i: (0, 0)),          # resident params
                    pl.BlockSpec((1, r), lambda i: (0, 0)),
                    pl.BlockSpec((r, c), lambda i: (0, 0)),
                    pl.BlockSpec((1, c), lambda i: (0, 0)),
                ],
                out_specs=pl.BlockSpec((nb, c, hw), lambda i: (i, 0, 0)),
            ),
            compiler_params=pltpu.CompilerParams(
                dimension_semantics=("parallel",),
                vmem_limit_bytes=_vmem_limit(cap, resident),
            ),
            cost_estimate=cost,
        )(x_flat, w1, b1_2d, w2, b2_2d)
        return out_flat.reshape(n, c, h, w)

    # --------------------------------------------------------------- two-pass
    # One batch element's (C, HW) tile doesn't fit the VMEM budget (or was
    # forced): split HW into lane-dense chunks; pass 1 reduces + emits the
    # gate, pass 2 streams x again and scales.  Extra cost: one more HBM read
    # of x, but it never blows VMEM on large feature maps.
    chunk = _choose_hw_chunk(hw, c, itemsize, tile_budget)
    if chunk is None:
        # TODO(synk): HW has no 128-multiple divisor small enough; would need a
        # masked / C-split fallback.
        raise NotImplementedError(
            "GatherExcite fallback needs a 128-multiple divisor of H*W that "
            f"fits VMEM (H*W={hw}, C={c}).")
    hw_chunks = hw // chunk
    resident = 4 * c * chunk * itemsize + param_bytes
    vlim = _vmem_limit(cap, resident)

    gate_kernel = functools.partial(_gather_gate_kernel, hw_total=hw,
                                    add_maxpool=add_maxpool)
    gate = pl.pallas_call(
        gate_kernel,
        out_shape=jax.ShapeDtypeStruct((n, 1, c), jnp.float32),
        grid_spec=pltpu.PrefetchScalarGridSpec(
            num_scalar_prefetch=0,
            grid=(n, hw_chunks),
            in_specs=[
                pl.BlockSpec((1, c, chunk), lambda i, j: (i, 0, j)),
                pl.BlockSpec((c, r), lambda i, j: (0, 0)),
                pl.BlockSpec((1, r), lambda i, j: (0, 0)),
                pl.BlockSpec((r, c), lambda i, j: (0, 0)),
                pl.BlockSpec((1, c), lambda i, j: (0, 0)),
            ],
            out_specs=pl.BlockSpec((1, 1, c), lambda i, j: (i, 0, 0)),
            scratch_shapes=[pltpu.VMEM((1, c), jnp.float32),
                            pltpu.VMEM((1, c), jnp.float32)],
        ),
        compiler_params=pltpu.CompilerParams(
            dimension_semantics=("parallel", "arbitrary"),
            vmem_limit_bytes=vlim,
        ),
        cost_estimate=pl.CostEstimate(
            flops=int(2 * n * c * hw + 4 * n * c * r),
            transcendentals=int(n * c),
            bytes_accessed=int(n * c * hw * itemsize + param_bytes + n * c * 4),
        ),
    )(x_flat, w1, b1_2d, w2, b2_2d)

    out_flat = pl.pallas_call(
        _scale_kernel,
        out_shape=jax.ShapeDtypeStruct((n, c, hw), x.dtype),
        grid_spec=pltpu.PrefetchScalarGridSpec(
            num_scalar_prefetch=0,
            grid=(n, hw_chunks),
            in_specs=[
                pl.BlockSpec((1, c, chunk), lambda i, j: (i, 0, j)),
                pl.BlockSpec((1, 1, c), lambda i, j: (i, 0, 0)),
            ],
            out_specs=pl.BlockSpec((1, c, chunk), lambda i, j: (i, 0, j)),
        ),
        compiler_params=pltpu.CompilerParams(
            dimension_semantics=("parallel", "parallel"),
            vmem_limit_bytes=vlim,
        ),
        cost_estimate=pl.CostEstimate(
            flops=int(n * c * hw),
            transcendentals=0,
            bytes_accessed=int(2 * n * c * hw * itemsize + n * c * 4),
        ),
    )(x_flat, gate)
    return out_flat.reshape(n, c, h, w)


# ---------------------------------------------------------------------------
# Reference & test
# ---------------------------------------------------------------------------
def _gather_excite_reference(x, w1, b1, w2, b2, *, add_maxpool=False):
    """Pure-JAX reference mirroring the PyTorch forward (for verification)."""
    s = jnp.mean(x, axis=(2, 3))                        # (N, C)
    if add_maxpool:
        s = 0.5 * s + 0.5 * jnp.max(x, axis=(2, 3))
    h = jnp.maximum(s @ w1 + b1, 0.0)                   # (N, R)
    y = h @ w2 + b2                                     # (N, C)
    return x * jax.nn.sigmoid(y)[:, :, None, None]


def _make_divisible(v, divisor=8, min_value=None, round_limit=0.9):
    # Mirrors timm's make_divisible used to pick rd_channels.
    min_value = min_value or divisor
    new_v = max(min_value, int(v + divisor / 2) // divisor * divisor)
    if new_v < round_limit * v:
        new_v += divisor
    return new_v


if __name__ == "__main__":
    # Shapes consistent with the module: N=2, C=64, H=W=16;
    # rd_channels = make_divisible(C/16, 1, round_limit=0.) == 4.
    N, C, H, W = 2, 64, 16, 16
    RD_RATIO = 1.0 / 16
    R = _make_divisible(C * RD_RATIO, 1, round_limit=0.0)

    key = jax.random.PRNGKey(0)
    kx, k1, k2, k3, k4 = jax.random.split(key, 5)
    x = jax.random.normal(kx, (N, C, H, W), dtype=jnp.float32)
    w1 = jax.random.normal(k1, (C, R), dtype=jnp.float32) * (1.0 / jnp.sqrt(C))
    b1 = jax.random.normal(k2, (R,), dtype=jnp.float32) * 0.1
    w2 = jax.random.normal(k3, (R, C), dtype=jnp.float32) * (1.0 / jnp.sqrt(R))
    b2 = jax.random.normal(k4, (C,), dtype=jnp.float32) * 0.1

    # Fused single-pass path (default / production path).
    out = jax.block_until_ready(gather_excite_forward(x, w1, b1, w2, b2))
    ref = _gather_excite_reference(x, w1, b1, w2, b2)
    assert out.shape == (N, C, H, W)
    assert bool(jnp.allclose(out, ref, atol=1e-4, rtol=1e-4)), "fused path mismatch"

    # add_maxpool variant.
    out_mp = jax.block_until_ready(
        gather_excite_forward(x, w1, b1, w2, b2, add_maxpool=True))
    ref_mp = _gather_excite_reference(x, w1, b1, w2, b2, add_maxpool=True)
    assert bool(jnp.allclose(out_mp, ref_mp, atol=1e-4, rtol=1e-4)), "maxpool mismatch"

    # Two-pass fallback (auto-selected when a single batch element's (C, HW)
    # tile exceeds the VMEM budget) — forced here to exercise the code path.
    out_tp = jax.block_until_ready(
        gather_excite_forward(x, w1, b1, w2, b2, force_two_pass=True))
    assert bool(jnp.allclose(out_tp, ref, atol=1e-4, rtol=1e-4)), "two-pass mismatch"

    print("KERNEL_OK")
</pallas_src>

<mosaic_0001>
module attributes {stable_mosaic.version = 11 : i64} {
  func.func @_gather_excite_fused_kernel(%arg0: i32, %arg1: memref<2x64x256xf32, #tpu.memory_space<vmem>>, %arg2: memref<64x4xf32, #tpu.memory_space<vmem>>, %arg3: memref<1x4xf32, #tpu.memory_space<vmem>>, %arg4: memref<4x64xf32, #tpu.memory_space<vmem>>, %arg5: memref<1x64xf32, #tpu.memory_space<vmem>>, %arg6: memref<2x64x256xf32, #tpu.memory_space<vmem>>) attributes {dimension_semantics = [#tpu.dimension_semantics<parallel>], iteration_bounds = array<i64: 1>, scalar_prefetch = 0 : i64, scratch_operands = 0 : i64, tpu.core_type = #tpu.core_type<tc>, window_params = [{transform_indices = @transform_0, window_bounds = array<i64: 2, 64, 256>}, {pipeline_mode = #tpu.pipeline_mode<synchronous>, transform_indices = @transform_1, window_bounds = array<i64: 64, 4>}, {pipeline_mode = #tpu.pipeline_mode<synchronous>, transform_indices = @transform_2, window_bounds = array<i64: 1, 4>}, {pipeline_mode = #tpu.pipeline_mode<synchronous>, transform_indices = @transform_3, window_bounds = array<i64: 4, 64>}, {pipeline_mode = #tpu.pipeline_mode<synchronous>, transform_indices = @transform_4, window_bounds = array<i64: 1, 64>}, {transform_indices = @transform_5, window_bounds = array<i64: 2, 64, 256>}]} {
    %c0 = arith.constant 0 : index
    %c0_0 = arith.constant 0 : index
    %c0_1 = arith.constant 0 : index
    %0 = vector.load %arg1[%c0, %c0_0, %c0_1] : memref<2x64x256xf32, #tpu.memory_space<vmem>>, vector<2x64x256xf32>
    %cst = arith.constant dense<0.000000e+00> : vector<2x64xf32>
    %1 = vector.multi_reduction <add>, %0, %cst [2] : vector<2x64x256xf32> to vector<2x64xf32>
    %cst_2 = arith.constant 2.560000e+02 : f32
    %2 = vector.broadcast %cst_2 : f32 to vector<2x64xf32>
    %3 = arith.divf %1, %2 : vector<2x64xf32>
    %c0_3 = arith.constant 0 : index
    %c0_4 = arith.constant 0 : index
    %4 = vector.load %arg2[%c0_3, %c0_4] : memref<64x4xf32, #tpu.memory_space<vmem>>, vector<64x4xf32>
    %cst_5 = arith.constant dense<0.000000e+00> : vector<2x4xf32>
    %5 = tpu.matmul %3, %4, %cst_5 {dimension_numbers = #tpu.dot_dimension_numbers<[1], [0], [0], [1], [0, 0, 1, 1], [], []>} : vector<2x64xf32>, vector<64x4xf32>, vector<2x4xf32> -> vector<2x4xf32>
    %c0_6 = arith.constant 0 : index
    %c0_7 = arith.constant 0 : index
    %6 = vector.load %arg3[%c0_6, %c0_7] : memref<1x4xf32, #tpu.memory_space<vmem>>, vector<1x4xf32>
    %7 = vector.broadcast %6 : vector<1x4xf32> to vector<2x4xf32>
    %8 = arith.addf %5, %7 : vector<2x4xf32>
    %cst_8 = arith.constant 0.000000e+00 : f32
    %9 = vector.broadcast %cst_8 : f32 to vector<2x4xf32>
    %10 = arith.maximumf %8, %9 : vector<2x4xf32>
    %c0_9 = arith.constant 0 : index
    %c0_10 = arith.constant 0 : index
    %11 = vector.load %arg4[%c0_9, %c0_10] : memref<4x64xf32, #tpu.memory_space<vmem>>, vector<4x64xf32>
    %cst_11 = arith.constant dense<0.000000e+00> : vector<2x64xf32>
    %12 = tpu.matmul %10, %11, %cst_11 {dimension_numbers = #tpu.dot_dimension_numbers<[1], [0], [0], [1], [0, 0, 1, 1], [], []>} : vector<2x4xf32>, vector<4x64xf32>, vector<2x64xf32> -> vector<2x64xf32>
    %c0_12 = arith.constant 0 : index
    %c0_13 = arith.constant 0 : index
    %13 = vector.load %arg5[%c0_12, %c0_13] : memref<1x64xf32, #tpu.memory_space<vmem>>, vector<1x64xf32>
    %14 = vector.broadcast %13 : vector<1x64xf32> to vector<2x64xf32>
    %15 = arith.addf %12, %14 : vector<2x64xf32>
    %16 = arith.negf %15 : vector<2x64xf32>
    %17 = math.exp %16 : vector<2x64xf32>
    %cst_14 = arith.constant 1.000000e+00 : f32
    %18 = vector.broadcast %cst_14 : f32 to vector<2x64xf32>
    %19 = arith.addf %18, %17 : vector<2x64xf32>
    %20 = arith.divf %18, %19 : vector<2x64xf32>
    %21 = vector.shape_cast %20 : vector<2x64xf32> to vector<2x64x1xf32>
    %22 = vector.broadcast %21 : vector<2x64x1xf32> to vector<2x64x256xf32>
    %23 = arith.mulf %0, %22 : vector<2x64x256xf32>
    %c0_15 = arith.constant 0 : index
    %c0_16 = arith.constant 0 : index
    %c0_17 = arith.constant 0 : index
    %24 = vector.load %arg6[%c0_15, %c0_16, %c0_17] : memref<2x64x256xf32, #tpu.memory_space<vmem>>, vector<2x64x256xf32>
    tpu.vector_store %arg6[%c0_15, %c0_16, %c0_17], %23 {strides = array<i32>} : memref<2x64x256xf32, #tpu.memory_space<vmem>>, vector<2x64x256xf32>,
    return
  }
  func.func @transform_0(%arg0: i32) -> (i32, i32, i32) {
    %c0_i32 = arith.constant 0 : i32
    %c0_i32_0 = arith.constant 0 : i32
    %c0_i32_1 = arith.constant 0 : i32
    return %arg0, %c0_i32, %c0_i32_0 : i32, i32, i32
  }
  func.func @transform_1(%arg0: i32) -> (i32, i32) {
    %c0_i32 = arith.constant 0 : i32
    %c0_i32_0 = arith.constant 0 : i32
    %c0_i32_1 = arith.constant 0 : i32
    return %c0_i32, %c0_i32_0 : i32, i32
  }
  func.func @transform_2(%arg0: i32) -> (i32, i32) {
    %c0_i32 = arith.constant 0 : i32
    %c0_i32_0 = arith.constant 0 : i32
    %c0_i32_1 = arith.constant 0 : i32
    return %c0_i32, %c0_i32_0 : i32, i32
  }
  func.func @transform_3(%arg0: i32) -> (i32, i32) {
    %c0_i32 = arith.constant 0 : i32
    %c0_i32_0 = arith.constant 0 : i32
    %c0_i32_1 = arith.constant 0 : i32
    return %c0_i32, %c0_i32_0 : i32, i32
  }
  func.func @transform_4(%arg0: i32) -> (i32, i32) {
    %c0_i32 = arith.constant 0 : i32
    %c0_i32_0 = arith.constant 0 : i32
    %c0_i32_1 = arith.constant 0 : i32
    return %c0_i32, %c0_i32_0 : i32, i32
  }
  func.func @transform_5(%arg0: i32) -> (i32, i32, i32) {
    %c0_i32 = arith.constant 0 : i32
    %c0_i32_0 = arith.constant 0 : i32
    %c0_i32_1 = arith.constant 0 : i32
    return %arg0, %c0_i32, %c0_i32_0 : i32, i32, i32
  }
}

</mosaic_0001>

<bundles_post_ra>
// kernel: tpu_custom_call.1
= control target key start
LH: loop header
LB: loop body
LE: loop exit
PB: predicated region body
PF: predicated region fallthrough
CT: control target
= control target key end

     0   :  { %10 = vsyncpa [#allocation3], 0  ;;  %s940_s0 = inlined_call_operand.hbm [shape: f32[2,64,256], index: 0, kind: input, shape index: {}]   ;;  %s941_s1 = inlined_call_operand.vmem [shape: f32[64,4], index: 1, kind: input, shape index: {}]   ;;  %s942_s2 = inlined_call_operand.vmem [shape: f32[1,4], index: 2, kind: input, shape index: {}]   ;;  %s943_s3 = inlined_call_operand.vmem [shape: f32[4,64], index: 3, kind: input, shape index: {}]   ;;  %s944_s4 = inlined_call_operand.vmem [shape: f32[1,64], index: 4, kind: input, shape index: {}]   ;;  %s945_s5 = inlined_call_operand.hbm [shape: f32[2,64,256], index: 5, kind: output, shape index: {}]  }
   0x1   :  { %11 = vsyncpa [#allocation4], 0  ;;  %s688_s18 = smov [#allocation2]   ;;  %s640_s22 = scalar_lea.hbm %s940_s0, 4096 }
   0x2   :  { %s17_s19 = sshll.u32 %s688_s18, 4  ;;  %p641_p0 = scmp.ne.s32.totalorder %s940_s0, %s640_s22  ;;  %s18_s19 = int_to_ptr.vmem [resolvable:$true] %s17_s19 }
   0x3   :  { %p644_p1 = scmp.lt.u32.totalorder %s640_s22, %s940_s0 }
   0x5   :  { %p646_p2 = pnand %p644_p1, %p641_p0 }
   0x7   :  { %649 = shalt.err (!%p646_p2)
}
   0x8   :  { %s650_s27 = scalar_lea.vmem %s18_s19, 4096  ;;  %p655_p4 = scmp.lt.s32.totalorder %s18_s19, %s18_s19 }
   0x9   :  { %p651_p3 = scmp.ne.s32.totalorder %s18_s19, %s650_s27  ;;  %p656_p5 = scmp.lt.s32.totalorder %s650_s27, %s650_s27 }
   0xb   :  { %p657_p6 = por %p656_p5, %p655_p4 }
   0xd   :  { %p658_p7 = pnand %p657_p6, %p651_p3 }
   0xf   :  { %661 = shalt.err (!%p658_p7)
}
  0x10   :  { %s689_s28 = smov 256   ;;  %s690_s29 = smov 16  }
  0x11   :  { %23 = dma.hbm_to_vmem [thread:$0]  %s940_s0, 4096, %s18_s19, [#allocation3], %s689_s28, %s689_s28, %s690_s29  }
  0x12   :  { %684 = dma.done.wait [#allocation3], 4096  }
  0x13   :  { %685 = vsyncadd [#allocation3], 4294963200  ;;  %v740_v0 = vld [vmem:[#allocation2 + $0x80] sm:$0xff]  ;;  %v742_v1 = vld [vmem:[#allocation2 + $0x88] sm:$0xff]  ;;  %v691_v51 = vmov 0.0|0.0   ;;  %vm692_vm0 = vmmov 0  }
  0x14   :  { %v744_v2 = vld [vmem:[#allocation2] sm:$0xff]  ;;  %v91_v3 = vadd.f32 %v742_v1, %v740_v0  ;;  %v748_v4 = vld [vmem:[#allocation2 + $0x8] sm:$0xff]  ;;  %v750_v5 = vld [vmem:[#allocation2 + $0x90] sm:$0xff]  ;;  %617 = vmatprep.subr.bf16.mxu0 %v691_v51  ;;  %v693_v61 = vmov 0.0   ;;  %vm174_vm1 = vcmask 130112   ;;  %vm181_vm2 = vcmask 195712  }
  0x15   :  { %v752_v6 = vld [vmem:[#allocation2 + $0x98] sm:$0xff]  ;;  %v67_v7 = vadd.f32 %v748_v4, %v744_v2  ;;  %v756_v8 = vld [vmem:[#allocation2 + $0x10] sm:$0xff]  ;;  %v764_v12 = vld [vmem:[#allocation2 + $0xa0] sm:$0xff]  ;;  %609 = vmatprep.mubr.msk.f32.mxu0 %vm692_vm0, %v693_v61  ;;  %612 = vmatprep.subr.mxu1 %v693_v61  ;;  %vm188_vm3 = vcmask 261312   ;;  %vm195_vm4 = vcmask 326912   ;;  %vm202_vm5 = vcmask 392512  }
  0x16   :  { %v758_v9 = vld [vmem:[#allocation2 + $0x18] sm:$0xff]  ;;  %92 = vadd.xlane.f32.xlu1 %v91_v3  ;;  %v94_v10 = vadd.f32 %v752_v6, %v750_v5  ;;  %v766_v13 = vld [vmem:[#allocation2 + $0xa8] sm:$0xff]  ;;  %v768_v14 = vld [vmem:[#allocation2 + $0x20] sm:$0xff]  ;;  %614 = vmatprep.mubr.msk.f32.mxu1 %vm692_vm0, %v693_v61  ;;  %vm209_vm6 = vcmask 458112   ;;  %vm216_vm7 = vcmask 523712   ;;  %vm257_vm8 = vcmask 1041409  }
  0x17   :  { %68 = vadd.xlane.f32.xlu0 %v67_v7  ;;  %v70_v11 = vadd.f32 %v758_v9, %v756_v8  ;;  %v770_v15 = vld [vmem:[#allocation2 + $0x28] sm:$0xff]  ;;  %v97_v16 = vadd.f32 %v766_v13, %v764_v12  ;;  %v776_v18 = vld [vmem:[#allocation2 + $0xb0] sm:$0xff]  ;;  %v778_v19 = vld [vmem:[#allocation2 + $0xb8] sm:$0xff]  ;;  %vm259_vm9 = vcmask 523264   ;;  %vm345_vm10 = vcmask 1043456  }
  0x18   :  { %v73_v17 = vadd.f32 %v770_v15, %v768_v14  ;;  %953 = vst [vmem:[#allocation8_spill] sm:$0xff] %v778_v19  ;;  %v780_v20 = vld [vmem:[#allocation2 + $0x30] sm:$0xff]  ;;  %v782_v21 = vld [vmem:[#allocation2 + $0x38] sm:$0xff]  ;;  %v100_v22 = vadd.f32 %v778_v19, %v776_v18  ;;  %v788_v24 = vld [vmem:[#allocation2 + $0xc0] sm:$0xff]  ;;  %vm341_vm11 = vcmask 31744  }
  0x19   :  { %v76_v23 = vadd.f32 %v782_v21, %v780_v20  ;;  %v790_v25 = vld [vmem:[#allocation2 + $0xc8] sm:$0xff]  ;;  %v792_v26 = vld [vmem:[#allocation2 + $0x40] sm:$0xff]  ;;  %v800_v30 = vld [vmem:[#allocation2 + $0xd0] sm:$0xff] }
  0x1a   :  { %95 = vadd.xlane.f32.xlu1 %v94_v10  ;;  %v794_v27 = vld [vmem:[#allocation2 + $0x48] sm:$0xff]  ;;  %v103_v28 = vadd.f32 %v790_v25, %v788_v24  ;;  %954 = vst [vmem:[#allocation9_spill] sm:$0xff] %v800_v30  ;;  %v802_v31 = vld [vmem:[#allocation2 + $0xd8] sm:$0xff]  ;;  %v804_v32 = vld [vmem:[#allocation2 + $0x50] sm:$0xff]  ;;  %v163_v10 = vlaneseq }
  0x1b   :  { %71 = vadd.xlane.f32.xlu0 %v70_v11  ;;  %v79_v29 = vadd.f32 %v794_v27, %v792_v26  ;;  %955 = vst [vmem:[#allocation10_spill] sm:$0xff] %v802_v31  ;;  %v806_v33 = vld [vmem:[#allocation2 + $0x58] sm:$0xff]  ;;  %v106_v34 = vadd.f32 %v802_v31, %v800_v30  ;;  %v812_v36 = vld [vmem:[#allocation2 + $0xe0] sm:$0xff]  ;;  %v814_v37 = vld [vmem:[#allocation2 + $0xe8] sm:$0xff] }
  0x1c   :  { %v82_v35 = vadd.f32 %v806_v33, %v804_v32  ;;  %956 = vst [vmem:[#allocation11_spill] sm:$0xff] %v812_v36  ;;  %957 = vst [vmem:[#allocation12_spill] sm:$0xff] %v814_v37  ;;  %v816_v38 = vld [vmem:[#allocation2 + $0x60] sm:$0xff]  ;;  %v818_v39 = vld [vmem:[#allocation2 + $0x68] sm:$0xff]  ;;  %v109_v40 = vadd.f32 %v814_v37, %v812_v36 }
  0x1d   :  { %v85_v41 = vadd.f32 %v818_v39, %v816_v38  ;;  %v824_v42 = vld [vmem:[#allocation2 + $0xf0] sm:$0xff]  ;;  %v826_v43 = vld [vmem:[#allocation2 + $0xf8] sm:$0xff]  ;;  %v132_v48 = vld [vmem:[%s941_s1] sm:$0xff] }
  0x1e   :  { %98 = vadd.xlane.f32.xlu1 %v97_v16  ;;  %958 = vst [vmem:[#allocation13_spill] sm:$0xff] %v824_v42  ;;  %959 = vst [vmem:[#allocation14_spill] sm:$0xff] %v826_v43  ;;  %v828_v44 = vld [vmem:[#allocation2 + $0x70] sm:$0xff]  ;;  %v830_v45 = vld [vmem:[#allocation2 + $0x78] sm:$0xff]  ;;  %v112_v46 = vadd.f32 %v826_v43, %v824_v42 }
  0x1f   :  { %74 = vadd.xlane.f32.xlu0 %v73_v17  ;;  %v88_v47 = vadd.f32 %v830_v45, %v828_v44  ;;  %v133_v49 = vld [vmem:[%s941_s1 + $0x8] sm:$0xff]  ;;  %v134_v52 = vld [vmem:[%s941_s1 + $0x10] sm:$0xff]  ;;  %v135_v53 = vld [vmem:[%s941_s1 + $0x18] sm:$0xff]  ;;  %v164_v17 = vand.u32 127, %v163_v10 }
  0x20   :  { %v618_v50 = vpack.c.bf16 %v133_v49, %v132_v48  ;;  %v621_v54 = vpack.c.bf16 %v135_v53, %v134_v52  ;;  %v136_v55 = vld [vmem:[%s941_s1 + $0x20] sm:$0xff]  ;;  %v137_v56 = vld [vmem:[%s941_s1 + $0x28] sm:$0xff]  ;;  %v138_v58 = vld [vmem:[%s941_s1 + $0x30] sm:$0xff] }
  0x21   :  { %v624_v57 = vpack.c.bf16 %v137_v56, %v136_v55  ;;  %v139_v59 = vld [vmem:[%s941_s1 + $0x38] sm:$0xff] }
  0x22   :  { %101 = vadd.xlane.f32.xlu1 %v100_v22  ;;  %619 = vmatpush3.bf16.msra.mxu0 %v618_v50  ;;  %v627_v60 = vpack.c.bf16 %v139_v59, %v138_v58 }
  0x23   :  { %77 = vadd.xlane.f32.xlu0 %v76_v23  ;;  %620 = vmatprep.subr.bf16.mxu0 %v691_v51  ;;  %v860_v23 = vshrl.u32 %v163_v10, 7 }
  0x26   :  { %104 = vadd.xlane.f32.xlu1 %v103_v28  ;;  %622 = vmatpush3.bf16.msra.mxu0 %v621_v54 }
  0x27   :  { %80 = vadd.xlane.f32.xlu0 %v79_v29  ;;  %623 = vmatprep.subr.bf16.mxu0 %v691_v51  ;;  %v169_v29 = vadd.s32 4294967288, %v164_v17 }
  0x29   :  { %v172_v49 = vsub.s32 %v169_v29, %v860_v23 }
  0x2a   :  { %107 = vadd.xlane.f32.xlu1 %v106_v34  ;;  %625 = vmatpush3.bf16.msra.mxu0 %v624_v57  ;;  %v176_v34 = vadd.s32 4294967280, %v164_v17 }
  0x2b   :  { %83 = vadd.xlane.f32.xlu0 %v82_v35  ;;  %626 = vmatprep.subr.bf16.mxu0 %v691_v51  ;;  %v183_v35 = vadd.s32 4294967272, %v164_v17  ;;  %v204_v51 = vadd.s32 4294967248, %v164_v17 }
  0x2c   :  { %v179_v50 = vsub.s32 %v176_v34, %v860_v23 }
  0x2d   :  { %v186_v53 = vsub.s32 %v183_v35, %v860_v23 }
  0x2e   :  { %110 = vadd.xlane.f32.xlu1 %v109_v40  ;;  %628 = vmatpush3.bf16.msra.mxu0 %v627_v60  ;;  %v190_v40 = vadd.s32 4294967264, %v164_v17 }
  0x2f   :  { %86 = vadd.xlane.f32.xlu0 %v85_v41 }
  0x30   :  { %v193_v54 = vsub.s32 %v190_v40, %v860_v23  ;;  %v211_v40 = vadd.s32 4294967240, %v164_v17 }
  0x32   :  { %113 = vadd.xlane.f32.xlu1 %v112_v46  ;;  %v197_v46 = vadd.s32 4294967256, %v164_v17 }
  0x33   :  { %89 = vadd.xlane.f32.xlu0 %v88_v47  ;;  %v167_v47 = vsub.s32 %v164_v17, %v860_v23  ;;  %v214_v17 = vsub.s32 %v211_v40, %v860_v23  ;;  %v576_v40 = vld [vmem:[%s942_s2] ss:$0 sm:$0xff]  ;;  %s694_s2 = smov [#allocation5]  }
  0x34   :  { %v200_v57 = vsub.s32 %v197_v46, %v860_v23 }
  0xa3   :  { %v93_v62 = vpop.xlane.xlu1 %92 }
  0xa4   :  { %v69_v63 = vpop.xlane.xlu0 %68  ;;  %v124_v59 = vmul.f32 0.00390625, %v93_v62 }
  0xa5   :  { %v116_v29 = vmul.f32 0.00390625, %v69_v63 }
  0xa6   :  { %v221_v37 = vrot.slane %v124_v59, %v167_v47 }
  0xa7   :  { %v96_v3 = vpop.xlane.xlu1 %95  ;;  %v168_v19 = vrot.slane %v116_v29, %v167_v47 }
  0xa8   :  { %v72_v7 = vpop.xlane.xlu0 %71  ;;  %v125_v52 = vmul.f32 0.00390625, %v96_v3  ;;  %v207_v3 = vsub.s32 %v204_v51, %v860_v23 }
  0xa9   :  { %v117_v55 = vmul.f32 0.00390625, %v72_v7 }
  0xaa   :  { %v225_v35 = vrot.slane %v125_v52, %v172_v49 }
  0xab   :  { %v99_v11 = vpop.xlane.xlu1 %98  ;;  %v173_v7 = vrot.slane %v117_v55, %v172_v49 }
  0xac   :  { %v75_v16 = vpop.xlane.xlu0 %74  ;;  %v126_v56 = vmul.f32 0.00390625, %v99_v11  ;;  %v226_v51 = vsel %vm174_vm1, %v225_v35, %v221_v37  ;;  %v333_v35 = vld [vmem:[%s943_s3] sm:$0xf]  ;;  %s564_s3 = sshll.u32 %s694_s2, 4  ;;  %s565_s3 = int_to_ptr.vmem [resolvable:$true] %s564_s3 }
  0xad   :  { %v118_v60 = vmul.f32 0.00390625, %v75_v16  ;;  %v175_v49 = vsel %vm174_vm1, %v173_v7, %v168_v19  ;;  %613 = vmatpush3.msk.msra.mxu1 %vm345_vm10, %v333_v35  ;;  %v961_v35 = vld [vmem:[#allocation11_spill] sm:$0xff]  ;;  %p667_p9 = scmp.lt.s32.totalorder %s565_s3, %s565_s3 }
  0xae   :  { %v230_v11 = vrot.slane %v126_v56, %v179_v50 }
  0xaf   :  { %v102_v22 = vpop.xlane.xlu1 %101  ;;  %v180_v62 = vrot.slane %v118_v60, %v179_v50 }
  0xb0   :  { %v78_v28 = vpop.xlane.xlu0 %77  ;;  %v127_v61 = vmul.f32 0.00390625, %v102_v22  ;;  %v231_v55 = vsel %vm181_vm2, %v230_v11, %v226_v51 }
  0xb1   :  { %v119_v34 = vmul.f32 0.00390625, %v78_v28  ;;  %v182_v59 = vsel %vm181_vm2, %v180_v62, %v175_v49 }
  0xb2   :  { %v235_v16 = vrot.slane %v127_v61, %v186_v53 }
  0xb3   :  { %v105_v41 = vpop.xlane.xlu1 %104  ;;  %v187_v63 = vrot.slane %v119_v34, %v186_v53 }
  0xb4   :  { %v81_v48 = vpop.xlane.xlu0 %80  ;;  %v128_v43 = vmul.f32 0.00390625, %v105_v41  ;;  %v236_v47 = vsel %vm188_vm3, %v235_v16, %v231_v55  ;;  %v578_v16 = vld [vmem:[%s944_s4] ss:$0 sm:$0xff]  ;;  %v462_v55 = vsub.s32 1, %v860_v23  ;;  %s662_s4 = scalar_lea.vmem %s565_s3, 4096 }
  0xb5   :  { %v120_v42 = vmul.f32 0.00390625, %v81_v48  ;;  %v189_v37 = vsel %vm188_vm3, %v187_v63, %v182_v59  ;;  %p663_p8 = scmp.ne.s32.totalorder %s565_s3, %s662_s4  ;;  %p668_p10 = scmp.lt.s32.totalorder %s662_s4, %s662_s4 }
  0xb6   :  { %v240_v28 = vrot.slane %v128_v43, %v193_v54 }
  0xb7   :  { %v108_v58 = vpop.xlane.xlu1 %107  ;;  %v194_v52 = vrot.slane %v120_v42, %v193_v54  ;;  %p669_p11 = por %p668_p10, %p667_p9 }
  0xb8   :  { %v84_v10 = vpop.xlane.xlu0 %83  ;;  %v129_v31 = vmul.f32 0.00390625, %v108_v58 }
  0xb9   :  { %v121_v30 = vmul.f32 0.00390625, %v84_v10  ;;  %v196_v19 = vsel %vm195_vm4, %v194_v52, %v189_v37  ;;  %p670_p12 = pnand %p669_p11, %p663_p8 }
  0xba   :  { %v245_v48 = vrot.slane %v129_v31, %v200_v57  ;;  %v241_v31 = vsel %vm195_vm4, %v240_v28, %v236_v47 }
  0xbb   :  { %v111_v46 = vpop.xlane.xlu1 %110  ;;  %v201_v56 = vrot.slane %v121_v30, %v200_v57 }
  0xbc   :  { %v130_v22 = vmul.f32 0.00390625, %v111_v46  ;;  %v87_v36 = vpop.xlane.xlu0 %86  ;;  %v246_v54 = vsel %vm202_vm5, %v245_v48, %v241_v31  ;;  %v427_v48 = vsub.s32 0, %v860_v23 }
  0xbd   :  { %v122_v41 = vmul.f32 0.00390625, %v87_v36  ;;  %v203_v57 = vsel %vm202_vm5, %v201_v56, %v196_v19 }
  0xbe   :  { %v250_v58 = vrot.slane %v130_v22, %v207_v3 }
  0xbf   :  { %v114_v50 = vpop.xlane.xlu1 %113  ;;  %v208_v53 = vrot.slane %v122_v41, %v207_v3 }
  0xc0   :  { %v131_v43 = vmul.f32 0.00390625, %v114_v50  ;;  %v90_v36 = vpop.xlane.xlu0 %89  ;;  %v251_v60 = vsel %vm209_vm6, %v250_v58, %v246_v54 }
  0xc1   :  { %v123_v42 = vmul.f32 0.00390625, %v90_v36  ;;  %v210_v10 = vsel %vm209_vm6, %v208_v53, %v203_v57 }
  0xc2   :  { %v255_v30 = vrot.slane %v131_v43, %v214_v17 }
  0xc3   :  { %v215_v61 = vrot.slane %v123_v42, %v214_v17 }
  0xc4   :  { %v256_v29 = vsel %vm216_vm7, %v255_v30, %v251_v60 }
  0xc5   :  { %v217_v34 = vsel %vm216_vm7, %v215_v61, %v210_v10 }
  0xc6   :  { %v258_v3 = vsel %vm257_vm8, %v256_v29, %v217_v34  ;;  %v960_v34 = vld [vmem:[#allocation8_spill] sm:$0xff] }
  0xc7   :  { %610 = vmatmul.mubr.msk.f32.vlgmr.msra.gmra.mrb[0].mxu0 %vm259_vm9, %v258_v3 }
 0x19a   :  { %v328_v7 = vpop.f32.mrb[0].mxu0 }
 0x19b   :  { %v329_v11 = vadd.f32 %v576_v40, %v328_v7  ;;  %v611_v46 = vpop.f32.mrb[1].mxu0  ;;  %v962_v7 = vld [vmem:[#allocation12_spill] sm:$0xff] }
 0x19d   :  { %v332_v62 = vmax.f32 %v329_v11, 0.0  ;;  %v964_v11 = vld [vmem:[#allocation10_spill] sm:$0xff] }
 0x19f   :  { %615 = vmatmul.mubr.msk.f32.vlgmr.msra.gmra.mrb[0].mxu1 %vm341_vm11, %v332_v62  ;;  %v965_v62 = vld [vmem:[#allocation13_spill] sm:$0xff] }
 0x272   :  { %v415_v22 = vpop.f32.mrb[0].mxu1 }
 0x273   :  { %v416_v63 = vadd.f32 %v578_v16, %v415_v22  ;;  %v616_v28 = vpop.f32.mrb[1].mxu1  ;;  %v966_v22 = vld [vmem:[#allocation14_spill] sm:$0xff] }
 0x275   :  { %v581_v41 = vmul.f32 -1.442695, %v416_v63 }
 0x277   :  { %636 = vpow2.f32 %v581_v41 }
 0x281   :  { %v637_v51 = vpop.eup %636 }
 0x282   :  { %v422_v52 = vadd.f32 1.0, %v637_v51 }
 0x284   :  { %638 = vrcp.f32 %v422_v52 }
 0x28e   :  { %v639_v17 = vpop.eup %638 }
 0x28f   :  { %v428_v49 = vrot.slane %v639_v17, %v427_v48  ;;  %v463_v56 = vrot.slane %v639_v17, %v462_v55 }
 0x291   :  { %434 = vbcast.lane.b32.xlu1 %v428_v49, 264  ;;  %430 = vbcast.lane.b32.xlu0 %v428_v49, 256 }
 0x295   :  { %438 = vbcast.lane.b32.xlu1 %v428_v49, 272  ;;  %446 = vbcast.lane.b32.xlu0 %v428_v49, 288 }
 0x299   :  { %442 = vbcast.lane.b32.xlu1 %v428_v49, 280  ;;  %454 = vbcast.lane.b32.xlu0 %v428_v49, 304 }
 0x29d   :  { %450 = vbcast.lane.b32.xlu1 %v428_v49, 296  ;;  %465 = vbcast.lane.b32.xlu0 %v463_v56, 256 }
 0x2a1   :  { %458 = vbcast.lane.b32.xlu1 %v428_v49, 312  ;;  %473 = vbcast.lane.b32.xlu0 %v463_v56, 272 }
 0x2a5   :  { %469 = vbcast.lane.b32.xlu1 %v463_v56, 264  ;;  %481 = vbcast.lane.b32.xlu0 %v463_v56, 288 }
 0x2a9   :  { %477 = vbcast.lane.b32.xlu1 %v463_v56, 280  ;;  %489 = vbcast.lane.b32.xlu0 %v463_v56, 304 }
 0x2ad   :  { %485 = vbcast.lane.b32.xlu1 %v463_v56, 296 }
 0x2b1   :  { %493 = vbcast.lane.b32.xlu1 %v463_v56, 312 }
 0x303   :  { %v435_v58 = vpop.permute.xlu1 %434  ;;  %v431_v50 = vpop.permute.xlu0 %430 }
 0x304   :  { %v497_v59 = vmul.f32 %v435_v58, %v756_v8  ;;  %v498_v47 = vmul.f32 %v435_v58, %v758_v9  ;;  %v495_v23 = vmul.f32 %v431_v50, %v744_v2  ;;  %v496_v53 = vmul.f32 %v431_v50, %v748_v4 }
 0x306   :  { %529 = vst [vmem:[#allocation5 + $0x10] sm:$0xff] %v497_v59  ;;  %530 = vst [vmem:[#allocation5 + $0x18] sm:$0xff] %v498_v47 }
 0x307   :  { %527 = vst [vmem:[#allocation5] sm:$0xff] %v495_v23  ;;  %528 = vst [vmem:[#allocation5 + $0x8] sm:$0xff] %v496_v53  ;;  %v439_v43 = vpop.permute.xlu1 %438  ;;  %v447_v36 = vpop.permute.xlu0 %446 }
 0x308   :  { %v499_v37 = vmul.f32 %v439_v43, %v768_v14  ;;  %v500_v31 = vmul.f32 %v439_v43, %v770_v15  ;;  %v503_v42 = vmul.f32 %v447_v36, %v792_v26  ;;  %v504_v8 = vmul.f32 %v447_v36, %v794_v27 }
 0x30a   :  { %531 = vst [vmem:[#allocation5 + $0x20] sm:$0xff] %v499_v37  ;;  %532 = vst [vmem:[#allocation5 + $0x28] sm:$0xff] %v500_v31 }
 0x30b   :  { %535 = vst [vmem:[#allocation5 + $0x40] sm:$0xff] %v503_v42  ;;  %536 = vst [vmem:[#allocation5 + $0x48] sm:$0xff] %v504_v8  ;;  %v443_v2 = vpop.permute.xlu1 %442  ;;  %v455_v4 = vpop.permute.xlu0 %454 }
 0x30c   :  { %v501_v9 = vmul.f32 %v443_v2, %v780_v20  ;;  %v502_v19 = vmul.f32 %v443_v2, %v782_v21  ;;  %v507_v54 = vmul.f32 %v455_v4, %v816_v38  ;;  %v508_v14 = vmul.f32 %v455_v4, %v818_v39 }
 0x30e   :  { %533 = vst [vmem:[#allocation5 + $0x30] sm:$0xff] %v501_v9  ;;  %534 = vst [vmem:[#allocation5 + $0x38] sm:$0xff] %v502_v19 }
 0x30f   :  { %539 = vst [vmem:[#allocation5 + $0x60] sm:$0xff] %v507_v54  ;;  %540 = vst [vmem:[#allocation5 + $0x68] sm:$0xff] %v508_v14  ;;  %v451_v15 = vpop.permute.xlu1 %450  ;;  %v466_v26 = vpop.permute.xlu0 %465 }
 0x310   :  { %v505_v27 = vmul.f32 %v451_v15, %v804_v32  ;;  %v506_v30 = vmul.f32 %v451_v15, %v806_v33  ;;  %v511_v57 = vmul.f32 %v466_v26, %v740_v0  ;;  %v512_v20 = vmul.f32 %v466_v26, %v742_v1 }
 0x312   :  { %537 = vst [vmem:[#allocation5 + $0x50] sm:$0xff] %v505_v27  ;;  %538 = vst [vmem:[#allocation5 + $0x58] sm:$0xff] %v506_v30 }
 0x313   :  { %543 = vst [vmem:[#allocation5 + $0x80] sm:$0xff] %v511_v57  ;;  %544 = vst [vmem:[#allocation5 + $0x88] sm:$0xff] %v512_v20  ;;  %v459_v21 = vpop.permute.xlu1 %458  ;;  %v474_v38 = vpop.permute.xlu0 %473 }
 0x314   :  { %v509_v39 = vmul.f32 %v459_v21, %v828_v44  ;;  %v510_v60 = vmul.f32 %v459_v21, %v830_v45  ;;  %v515_v61 = vmul.f32 %v474_v38, %v764_v12  ;;  %v516_v32 = vmul.f32 %v474_v38, %v766_v13 }
 0x316   :  { %541 = vst [vmem:[#allocation5 + $0x70] sm:$0xff] %v509_v39  ;;  %542 = vst [vmem:[#allocation5 + $0x78] sm:$0xff] %v510_v60 }
 0x317   :  { %547 = vst [vmem:[#allocation5 + $0xa0] sm:$0xff] %v515_v61  ;;  %548 = vst [vmem:[#allocation5 + $0xa8] sm:$0xff] %v516_v32  ;;  %v470_v0 = vpop.permute.xlu1 %469  ;;  %v482_v1 = vpop.permute.xlu0 %481 }
 0x318   :  { %v513_v33 = vmul.f32 %v470_v0, %v750_v5  ;;  %v514_v10 = vmul.f32 %v470_v0, %v752_v6  ;;  %v519_v29 = vmul.f32 %v482_v1, %v788_v24  ;;  %v520_v44 = vmul.f32 %v482_v1, %v790_v25  ;;  %v963_v24 = vld [vmem:[#allocation9_spill] sm:$0xff] }
 0x31a   :  { %545 = vst [vmem:[#allocation5 + $0x90] sm:$0xff] %v513_v33  ;;  %546 = vst [vmem:[#allocation5 + $0x98] sm:$0xff] %v514_v10 }
 0x31b   :  { %551 = vst [vmem:[#allocation5 + $0xc0] sm:$0xff] %v519_v29  ;;  %552 = vst [vmem:[#allocation5 + $0xc8] sm:$0xff] %v520_v44  ;;  %v478_v12 = vpop.permute.xlu1 %477  ;;  %v490_v13 = vpop.permute.xlu0 %489 }
 0x31c   :  { %v517_v45 = vmul.f32 %v478_v12, %v776_v18  ;;  %v518_v3 = vmul.f32 %v478_v12, %v960_v34  ;;  %v523_v40 = vmul.f32 %v490_v13, %v961_v35  ;;  %v524_v5 = vmul.f32 %v490_v13, %v962_v7 }
 0x31e   :  { %549 = vst [vmem:[#allocation5 + $0xb0] sm:$0xff] %v517_v45  ;;  %550 = vst [vmem:[#allocation5 + $0xb8] sm:$0xff] %v518_v3 }
 0x31f   :  { %555 = vst [vmem:[#allocation5 + $0xe0] sm:$0xff] %v523_v40  ;;  %556 = vst [vmem:[#allocation5 + $0xe8] sm:$0xff] %v524_v5  ;;  %v486_v6 = vpop.permute.xlu1 %485 }
 0x320   :  { %v521_v25 = vmul.f32 %v486_v6, %v963_v24  ;;  %v522_v46 = vmul.f32 %v486_v6, %v964_v11 }
 0x322   :  { %553 = vst [vmem:[#allocation5 + $0xd0] sm:$0xff] %v521_v25  ;;  %554 = vst [vmem:[#allocation5 + $0xd8] sm:$0xff] %v522_v46 }
 0x323   :  { %v494_v18 = vpop.permute.xlu1 %493 }
 0x324   :  { %v525_v16 = vmul.f32 %v494_v18, %v965_v62  ;;  %v526_v63 = vmul.f32 %v494_v18, %v966_v22 }
 0x326   :  { %557 = vst [vmem:[#allocation5 + $0xf0] sm:$0xff] %v525_v16  ;;  %558 = vst [vmem:[#allocation5 + $0xf8] sm:$0xff] %v526_v63 }
 0x327   :  { %673 = shalt.err (!%p670_p12)
}
 0x328   :  { %s674_s6 = scalar_lea.hbm %s945_s5, 4096 }
 0x329   :  { %p675_p13 = scmp.ne.s32.totalorder %s945_s5, %s674_s6  ;;  %p678_p0 = scmp.lt.u32.totalorder %s674_s6, %s945_s5 }
 0x32b   :  { %p680_p1 = pnand %p678_p0, %p675_p13 }
 0x32d   :  { %683 = shalt.err (!%p680_p1)
}
 0x32e   :  { %570 = dma.vmem_to_hbm [thread:$0]  %s565_s3, 4096, %s945_s5, [#allocation4], %s689_s28, %s689_s28, %s690_s29  }
 0x32f   :  { %686 = dma.done.wait [#allocation4], 4096  }
 0x330   :  { %687 = vsyncadd [#allocation4], 4294963200 }
 0x331   :  { %574 = vsyncpa [#allocation3], 1 }
 0x332   :  { %575 = vsyncpa [#allocation4], 1 }

</bundles_post_ra>
